<compile_context>
chip_gen: v7x
topology: tpu7x:2x2x1
jax: 0.10.0
libtpu: 0.0.40
codegen_flags: <defaults>
</compile_context>

<pallas_src>
import jax
import jax.numpy as jnp
from jax.experimental import pallas as pl
from jax.experimental.pallas import tpu as pltpu

LANE = 128      # TPU lane width: every feature axis is padded to this
SUBLANE = 8     # TPU sublane width: graph/batch axis of the pooled output


def gnn_kernel(x_ref, a_ref, p_ref,
               w1_ref, b1_ref,
               w2_ref, b2_ref,
               w3_ref, b3_ref,
               wl_ref, bl_ref,
               out_ref):
    f32 = jnp.float32
    bf16 = jnp.bfloat16
    a = a_ref[...]          # [N, N] bf16 adjacency, A[i, j] = #edges j -> i

    def graph_conv(h, w_stack, b):
        # torch_geometric GraphConv (aggr='add'):
        #   out_i = W_rel @ (sum_{j->i} h_j) + W_root @ h_i + b
        # Aggregation: bf16 x bf16 MXU matmul, f32 accumulate.
        aggr = jnp.dot(a, h.astype(bf16), preferred_element_type=f32)   # [N, LANE]
        # Fused rel/root matmul: [aggr | h] @ [[W_rel],[W_root]].
        hh = jnp.concatenate([aggr, h], axis=-1)                        # [N, 2*LANE]
        return jnp.dot(hh, w_stack, preferred_element_type=f32) + b

    h = jnp.maximum(graph_conv(x_ref[...], w1_ref[...], b1_ref[...]), 0.0)
    h = jnp.maximum(graph_conv(h, w2_ref[...], b2_ref[...]), 0.0)
    h = graph_conv(h, w3_ref[...], b3_ref[...])          # no relu after conv3

    pooled = jnp.dot(p_ref[...], h, preferred_element_type=f32)   # global_mean_pool
    # F.dropout(p=0.5, training=False) is the identity in eval mode.
    out_ref[...] = (jnp.dot(pooled, wl_ref[...], preferred_element_type=f32)
                    + bl_ref[...])                        # lane-dense (8, 128) store


def gnn_forward(x_pad, a_bf16, p_pad, w1s, b1, w2s, b2, w3s, b3, wl, bl):
    vmem = lambda: pl.BlockSpec(memory_space=pltpu.MemorySpace.VMEM)
    args = (x_pad, a_bf16, p_pad, w1s, b1, w2s, b2, w3s, b3, wl, bl)
    return pl.pallas_call(
        gnn_kernel,
        out_shape=jax.ShapeDtypeStruct((p_pad.shape[0], LANE), jnp.float32),
        in_specs=[vmem() for _ in args],
        out_specs=vmem(),
        compiler_params=pltpu.CompilerParams(vmem_limit_bytes=64 * 1024 * 1024),
    )(*args)


def prepare_inputs(x, a, p, params):
    """Wrapper-side (one-time) padding + weight stacking for the kernel."""
    n, f_in = x.shape
    hidden = params["w1_rel"].shape[1]
    num_classes = params["w_lin"].shape[1]
    num_graphs = p.shape[0]

    # Node features: zero-pad lanes to 128.
    x_pad = jnp.zeros((n, LANE), jnp.float32).at[:, :f_in].set(x)

    # Pooling matrix: zero-pad graph axis to a sublane multiple (rows of zeros
    # produce zero pooled rows that are sliced off after the kernel).
    gp = max(SUBLANE, ((num_graphs + SUBLANE - 1) // SUBLANE) * SUBLANE)
    p_pad = jnp.zeros((gp, n), jnp.float32).at[:num_graphs, :].set(p)

    # Adjacency holds small integer edge counts -> exactly representable in bf16.
    assert float(jnp.max(a)) <= 256.0, "edge multiplicity too large for exact bf16"
    a_bf16 = a.astype(jnp.bfloat16)

    def stack(w_rel, w_root, b, fan_in):
        # Stacked weight [2*LANE, LANE]: rows [0:fan_in] take the aggregated
        # message, rows [LANE:LANE+fan_in] the root features; padded region is 0.
        ws = jnp.zeros((2 * LANE, LANE), jnp.float32)
        ws = ws.at[:fan_in, :w_rel.shape[1]].set(w_rel)
        ws = ws.at[LANE:LANE + fan_in, :w_root.shape[1]].set(w_root)
        bp = jnp.zeros((1, LANE), jnp.float32).at[:, :b.shape[1]].set(b)
        return ws, bp

    w1s, b1p = stack(params["w1_rel"], params["w1_root"], params["b1"], f_in)
    w2s, b2p = stack(params["w2_rel"], params["w2_root"], params["b2"], hidden)
    w3s, b3p = stack(params["w3_rel"], params["w3_root"], params["b3"], hidden)

    wl_pad = (jnp.zeros((LANE, LANE), jnp.float32)
              .at[:hidden, :num_classes].set(params["w_lin"]))
    bl_pad = jnp.zeros((1, LANE), jnp.float32).at[:, :num_classes].set(params["b_lin"])

    return (x_pad, a_bf16, p_pad, w1s, b1p, w2s, b2p, w3s, b3p, wl_pad, bl_pad)


if __name__ == "__main__":
    key = jax.random.PRNGKey(0)
    N, F_IN, HIDDEN, NUM_CLASSES, NUM_GRAPHS = 16, 8, 32, 4, 2
    E = 48
    keys = jax.random.split(key, 11)

    x = jax.random.normal(keys[0], (N, F_IN), dtype=jnp.float32)

    # edge_index: [2, E]; edges kept within each graph (N/NUM_GRAPHS nodes per graph)
    nodes_per_graph = N // NUM_GRAPHS
    src = jax.random.randint(keys[1], (E,), 0, nodes_per_graph)
    dst = jax.random.randint(keys[2], (E,), 0, nodes_per_graph)
    graph_of_edge = jax.random.randint(keys[3], (E,), 0, NUM_GRAPHS)
    offset = graph_of_edge * nodes_per_graph
    edge_index = jnp.stack([src + offset, dst + offset], axis=0)

    batch = jnp.repeat(jnp.arange(NUM_GRAPHS), nodes_per_graph)

    # Dense adjacency for 'add' aggregation: A[i, j] = #edges j -> i
    a = jnp.zeros((N, N), jnp.float32).at[edge_index[1], edge_index[0]].add(1.0)

    # Mean-pool matrix P[b, n] = 1/count_b if batch[n] == b else 0
    one_hot = (batch[None, :] == jnp.arange(NUM_GRAPHS)[:, None]).astype(jnp.float32)
    counts = jnp.maximum(one_hot.sum(axis=1, keepdims=True), 1.0)
    p = one_hot / counts

    # Deterministic parameter init (PyTorch-Linear-style uniform(-1/sqrt(fan_in), ...))
    def linear_init(k, fan_in, fan_out):
        k1, k2 = jax.random.split(k)
        bound = 1.0 / float(fan_in) ** 0.5
        w = jax.random.uniform(k1, (fan_in, fan_out), jnp.float32, -bound, bound)
        b = jax.random.uniform(k2, (1, fan_out), jnp.float32, -bound, bound)
        return w, b

    w1r, b1 = linear_init(keys[4], F_IN, HIDDEN)
    w1n, _ = linear_init(keys[5], F_IN, HIDDEN)      # GraphConv root linear has no bias
    w2r, b2 = linear_init(keys[6], HIDDEN, HIDDEN)
    w2n, _ = linear_init(keys[7], HIDDEN, HIDDEN)
    w3r, b3 = linear_init(keys[8], HIDDEN, HIDDEN)
    w3n, _ = linear_init(keys[9], HIDDEN, HIDDEN)
    wl, bl = linear_init(keys[10], HIDDEN, NUM_CLASSES)

    params = dict(w1_rel=w1r, w1_root=w1n, b1=b1,
                  w2_rel=w2r, w2_root=w2n, b2=b2,
                  w3_rel=w3r, w3_root=w3n, b3=b3,
                  w_lin=wl, b_lin=bl)

    kernel_args = prepare_inputs(x, a, p, params)
    out_pad = jax.block_until_ready(gnn_forward(*kernel_args))
    out = out_pad[:NUM_GRAPHS, :NUM_CLASSES]

    # Pure-JAX reference matching the kernel's numerics (bf16 adjacency & bf16
    # activations feeding the aggregation matmul, f32 accumulation/everything
    # else).  The bf16 adjacency holds integer edge counts exactly, so the only
    # delta vs the pure-f32 module is the bf16 rounding of the aggregated
    # activations.
    a_bf = a.astype(jnp.bfloat16)

    def conv_ref(h, wr, wn, b):
        aggr = jnp.dot(a_bf, h.astype(jnp.bfloat16),
                       preferred_element_type=jnp.float32)
        return aggr @ wr + h @ wn + b

    h = jax.nn.relu(conv_ref(x, w1r, w1n, b1))
    h = jax.nn.relu(conv_ref(h, w2r, w2n, b2))
    h = conv_ref(h, w3r, w3n, b3)
    ref = p @ h @ wl + bl

    assert out.shape == (NUM_GRAPHS, NUM_CLASSES)
    assert jnp.allclose(out, ref, atol=1e-3, rtol=1e-3)

    print("KERNEL_OK")
</pallas_src>

<mosaic_0001>
module attributes {stable_mosaic.version = 11 : i64} {
  func.func @gnn_kernel(%arg0: memref<16x128xf32, #tpu.memory_space<vmem>>, %arg1: memref<16x16xbf16, #tpu.memory_space<vmem>>, %arg2: memref<8x16xf32, #tpu.memory_space<vmem>>, %arg3: memref<256x128xf32, #tpu.memory_space<vmem>>, %arg4: memref<1x128xf32, #tpu.memory_space<vmem>>, %arg5: memref<256x128xf32, #tpu.memory_space<vmem>>, %arg6: memref<1x128xf32, #tpu.memory_space<vmem>>, %arg7: memref<256x128xf32, #tpu.memory_space<vmem>>, %arg8: memref<1x128xf32, #tpu.memory_space<vmem>>, %arg9: memref<128x128xf32, #tpu.memory_space<vmem>>, %arg10: memref<1x128xf32, #tpu.memory_space<vmem>>, %arg11: memref<8x128xf32, #tpu.memory_space<vmem>>) attributes {dimension_semantics = [], scalar_prefetch = 0 : i64, scratch_operands = 0 : i64, tpu.core_type = #tpu.core_type<tc>} {
    %c0 = arith.constant 0 : index
    %c0_0 = arith.constant 0 : index
    %0 = vector.load %arg1[%c0, %c0_0] : memref<16x16xbf16, #tpu.memory_space<vmem>>, vector<16x16xbf16>
    %c0_1 = arith.constant 0 : index
    %c0_2 = arith.constant 0 : index
    %1 = vector.load %arg0[%c0_1, %c0_2] : memref<16x128xf32, #tpu.memory_space<vmem>>, vector<16x128xf32>
    %c0_3 = arith.constant 0 : index
    %c0_4 = arith.constant 0 : index
    %2 = vector.load %arg3[%c0_3, %c0_4] : memref<256x128xf32, #tpu.memory_space<vmem>>, vector<256x128xf32>
    %c0_5 = arith.constant 0 : index
    %c0_6 = arith.constant 0 : index
    %3 = vector.load %arg4[%c0_5, %c0_6] : memref<1x128xf32, #tpu.memory_space<vmem>>, vector<1x128xf32>
    %4 = arith.truncf %1 : vector<16x128xf32> to vector<16x128xbf16>
    %cst = arith.constant dense<0.000000e+00> : vector<16x128xf32>
    %5 = tpu.matmul %0, %4, %cst {dimension_numbers = #tpu.dot_dimension_numbers<[1], [0], [0], [1], [0, 0, 1, 1], [], []>} : vector<16x16xbf16>, vector<16x128xbf16>, vector<16x128xf32> -> vector<16x128xf32>
    %6 = tpu.concatenate %5, %1 in 1 : vector<16x128xf32>, vector<16x128xf32> -> vector<16x256xf32>
    %cst_7 = arith.constant dense<0.000000e+00> : vector<16x128xf32>
    %7 = tpu.matmul %6, %2, %cst_7 {dimension_numbers = #tpu.dot_dimension_numbers<[1], [0], [0], [1], [0, 0, 1, 1], [], []>} : vector<16x256xf32>, vector<256x128xf32>, vector<16x128xf32> -> vector<16x128xf32>
    %8 = vector.broadcast %3 : vector<1x128xf32> to vector<16x128xf32>
    %9 = arith.addf %7, %8 : vector<16x128xf32>
    %cst_8 = arith.constant 0.000000e+00 : f32
    %10 = vector.broadcast %cst_8 : f32 to vector<16x128xf32>
    %11 = arith.maximumf %9, %10 : vector<16x128xf32>
    %c0_9 = arith.constant 0 : index
    %c0_10 = arith.constant 0 : index
    %12 = vector.load %arg5[%c0_9, %c0_10] : memref<256x128xf32, #tpu.memory_space<vmem>>, vector<256x128xf32>
    %c0_11 = arith.constant 0 : index
    %c0_12 = arith.constant 0 : index
    %13 = vector.load %arg6[%c0_11, %c0_12] : memref<1x128xf32, #tpu.memory_space<vmem>>, vector<1x128xf32>
    %14 = arith.truncf %11 : vector<16x128xf32> to vector<16x128xbf16>
    %cst_13 = arith.constant dense<0.000000e+00> : vector<16x128xf32>
    %15 = tpu.matmul %0, %14, %cst_13 {dimension_numbers = #tpu.dot_dimension_numbers<[1], [0], [0], [1], [0, 0, 1, 1], [], []>} : vector<16x16xbf16>, vector<16x128xbf16>, vector<16x128xf32> -> vector<16x128xf32>
    %16 = tpu.concatenate %15, %11 in 1 : vector<16x128xf32>, vector<16x128xf32> -> vector<16x256xf32>
    %cst_14 = arith.constant dense<0.000000e+00> : vector<16x128xf32>
    %17 = tpu.matmul %16, %12, %cst_14 {dimension_numbers = #tpu.dot_dimension_numbers<[1], [0], [0], [1], [0, 0, 1, 1], [], []>} : vector<16x256xf32>, vector<256x128xf32>, vector<16x128xf32> -> vector<16x128xf32>
    %18 = vector.broadcast %13 : vector<1x128xf32> to vector<16x128xf32>
    %19 = arith.addf %17, %18 : vector<16x128xf32>
    %cst_15 = arith.constant 0.000000e+00 : f32
    %20 = vector.broadcast %cst_15 : f32 to vector<16x128xf32>
    %21 = arith.maximumf %19, %20 : vector<16x128xf32>
    %c0_16 = arith.constant 0 : index
    %c0_17 = arith.constant 0 : index
    %22 = vector.load %arg7[%c0_16, %c0_17] : memref<256x128xf32, #tpu.memory_space<vmem>>, vector<256x128xf32>
    %c0_18 = arith.constant 0 : index
    %c0_19 = arith.constant 0 : index
    %23 = vector.load %arg8[%c0_18, %c0_19] : memref<1x128xf32, #tpu.memory_space<vmem>>, vector<1x128xf32>
    %24 = arith.truncf %21 : vector<16x128xf32> to vector<16x128xbf16>
    %cst_20 = arith.constant dense<0.000000e+00> : vector<16x128xf32>
    %25 = tpu.matmul %0, %24, %cst_20 {dimension_numbers = #tpu.dot_dimension_numbers<[1], [0], [0], [1], [0, 0, 1, 1], [], []>} : vector<16x16xbf16>, vector<16x128xbf16>, vector<16x128xf32> -> vector<16x128xf32>
    %26 = tpu.concatenate %25, %21 in 1 : vector<16x128xf32>, vector<16x128xf32> -> vector<16x256xf32>
    %cst_21 = arith.constant dense<0.000000e+00> : vector<16x128xf32>
    %27 = tpu.matmul %26, %22, %cst_21 {dimension_numbers = #tpu.dot_dimension_numbers<[1], [0], [0], [1], [0, 0, 1, 1], [], []>} : vector<16x256xf32>, vector<256x128xf32>, vector<16x128xf32> -> vector<16x128xf32>
    %28 = vector.broadcast %23 : vector<1x128xf32> to vector<16x128xf32>
    %29 = arith.addf %27, %28 : vector<16x128xf32>
    %c0_22 = arith.constant 0 : index
    %c0_23 = arith.constant 0 : index
    %30 = vector.load %arg2[%c0_22, %c0_23] : memref<8x16xf32, #tpu.memory_space<vmem>>, vector<8x16xf32>
    %cst_24 = arith.constant dense<0.000000e+00> : vector<8x128xf32>
    %31 = tpu.matmul %30, %29, %cst_24 {dimension_numbers = #tpu.dot_dimension_numbers<[1], [0], [0], [1], [0, 0, 1, 1], [], []>} : vector<8x16xf32>, vector<16x128xf32>, vector<8x128xf32> -> vector<8x128xf32>
    %c0_25 = arith.constant 0 : index
    %c0_26 = arith.constant 0 : index
    %32 = vector.load %arg9[%c0_25, %c0_26] : memref<128x128xf32, #tpu.memory_space<vmem>>, vector<128x128xf32>
    %cst_27 = arith.constant dense<0.000000e+00> : vector<8x128xf32>
    %33 = tpu.matmul %31, %32, %cst_27 {dimension_numbers = #tpu.dot_dimension_numbers<[1], [0], [0], [1], [0, 0, 1, 1], [], []>} : vector<8x128xf32>, vector<128x128xf32>, vector<8x128xf32> -> vector<8x128xf32>
    %c0_28 = arith.constant 0 : index
    %c0_29 = arith.constant 0 : index
    %34 = vector.load %arg10[%c0_28, %c0_29] : memref<1x128xf32, #tpu.memory_space<vmem>>, vector<1x128xf32>
    %35 = vector.broadcast %34 : vector<1x128xf32> to vector<8x128xf32>
    %36 = arith.addf %33, %35 : vector<8x128xf32>
    %c0_30 = arith.constant 0 : index
    %c0_31 = arith.constant 0 : index
    %37 = vector.load %arg11[%c0_30, %c0_31] : memref<8x128xf32, #tpu.memory_space<vmem>>, vector<8x128xf32>
    tpu.vector_store %arg11[%c0_30, %c0_31], %36 {strides = array<i32>} : memref<8x128xf32, #tpu.memory_space<vmem>>, vector<8x128xf32>,
    return
  }
}

</mosaic_0001>

<bundles_post_ra>
// kernel: tpu_custom_call.1
= control target key start
LH: loop header
LB: loop body
LE: loop exit
PB: predicated region body
PF: predicated region fallthrough
CT: control target
= control target key end

     0   :  { %16 = vsyncpa [#allocation3], 0  ;;  %s1760_s0 = inlined_call_operand.hbm [shape: f32[16,128], index: 0, kind: input, shape index: {}]   ;;  %s1761_s1 = inlined_call_operand.hbm [shape: bf16[16,16], index: 1, kind: input, shape index: {}]   ;;  %s1762_s2 = inlined_call_operand.hbm [shape: f32[8,16], index: 2, kind: input, shape index: {}]   ;;  %s1763_s3 = inlined_call_operand.hbm [shape: f32[256,128], index: 3, kind: input, shape index: {}]   ;;  %s1764_s4 = inlined_call_operand.hbm [shape: f32[1,128], index: 4, kind: input, shape index: {}]   ;;  %s1765_s5 = inlined_call_operand.hbm [shape: f32[256,128], index: 5, kind: input, shape index: {}]   ;;  %s1766_s6 = inlined_call_operand.hbm [shape: f32[1,128], index: 6, kind: input, shape index: {}]   ;;  %s1767_s7 = inlined_call_operand.hbm [shape: f32[256,128], index: 7, kind: input, shape index: {}]   ;;  %s1768_s8 = inlined_call_operand.hbm [shape: f32[1,128], index: 8, kind: input, shape index: {}]   ;;  %s1769_s9 = inlined_call_operand.hbm [shape: f32[128,128], index: 9, kind: input, shape index: {}]   ;;  %s1770_s10 = inlined_call_operand.hbm [shape: f32[1,128], index: 10, kind: input, shape index: {}]   ;;  %s1771_s11 = inlined_call_operand.hbm [shape: f32[8,128], index: 11, kind: output, shape index: {}]  }
   0x1   :  { %17 = vsyncpa [#allocation6], 0 }
   0x2   :  { %18 = vsyncpa [#allocation9], 0 }
   0x3   :  { %19 = vsyncpa [#allocation12], 0 }
   0x4   :  { %20 = vsyncpa [#allocation15], 0 }
   0x5   :  { %21 = vsyncpa [#allocation18], 0 }
   0x6   :  { %22 = vsyncpa [#allocation4], 0  ;;  %s1482_s17 = smov [#allocation5]   ;;  %s1204_s21 = scalar_lea.hbm %s1761_s1, 128 }
   0x7   :  { %s40_s18 = sshll.u32 %s1482_s17, 4  ;;  %p1205_p0 = scmp.ne.s32.totalorder %s1761_s1, %s1204_s21  ;;  %s41_s18 = int_to_ptr.vmem [resolvable:$true] %s40_s18 }
   0x8   :  { %p1208_p1 = scmp.lt.u32.totalorder %s1204_s21, %s1761_s1 }
   0xa   :  { %p1210_p2 = pnand %p1208_p1, %p1205_p0 }
   0xc   :  { %1213 = shalt.err (!%p1210_p2)
}
   0xd   :  { %s1214_s26 = scalar_lea.vmem %s41_s18, 128  ;;  %p1219_p4 = scmp.lt.s32.totalorder %s41_s18, %s41_s18 }
   0xe   :  { %p1215_p3 = scmp.ne.s32.totalorder %s41_s18, %s1214_s26  ;;  %p1220_p5 = scmp.lt.s32.totalorder %s1214_s26, %s1214_s26 }
  0x10   :  { %p1221_p6 = por %p1220_p5, %p1219_p4 }
  0x12   :  { %p1222_p7 = pnand %p1221_p6, %p1215_p3 }
  0x14   :  { %1225 = shalt.err (!%p1222_p7)
}
  0x15   :  { %s1483_s27 = smov 64   ;;  %s1484_s28 = smov 4  }
  0x16   :  { %46 = dma.hbm_to_vmem [thread:$0]  %s1761_s1, 128, %s41_s18, [#allocation6], %s1483_s27, %s1483_s27, %s1484_s28  }
  0x17   :  { %s1485_s12 = smov [#allocation8]   ;;  %s1486_s14 = smov [#allocation11]  }
  0x18   :  { %s62_s13 = sshll.u32 %s1485_s12, 4  ;;  %s84_s15 = sshll.u32 %s1486_s14, 4  ;;  %s63_s13 = int_to_ptr.vmem [resolvable:$true] %s62_s13  ;;  %s85_s15 = int_to_ptr.vmem [resolvable:$true] %s84_s15 }
  0x19   :  { %s1226_s19 = scalar_lea.hbm %s1763_s3, 4096 }
  0x1a   :  { %p1227_p8 = scmp.ne.s32.totalorder %s1763_s3, %s1226_s19  ;;  %p1230_p9 = scmp.lt.u32.totalorder %s1226_s19, %s1763_s3 }
  0x1c   :  { %p1232_p10 = pnand %p1230_p9, %p1227_p8 }
  0x1e   :  { %1235 = shalt.err (!%p1232_p10)
}
  0x1f   :  { %s1236_s1 = scalar_lea.vmem %s63_s13, 4096  ;;  %p1241_p12 = scmp.lt.s32.totalorder %s63_s13, %s63_s13 }
  0x20   :  { %p1237_p11 = scmp.ne.s32.totalorder %s63_s13, %s1236_s1  ;;  %p1242_p13 = scmp.lt.s32.totalorder %s1236_s1, %s1236_s1 }
  0x22   :  { %p1243_p0 = por %p1242_p13, %p1241_p12 }
  0x24   :  { %p1244_p1 = pnand %p1243_p0, %p1237_p11 }
  0x26   :  { %1247 = shalt.err (!%p1244_p1)
}
  0x27   :  { %s1487_s18 = smov 128   ;;  %s1488_s24 = smov 8  }
  0x28   :  { %68 = dma.hbm_to_vmem [thread:$0]  %s1763_s3, 4096, %s63_s13, [#allocation9], %s1487_s18, %s1487_s18, %s1488_s24  }
  0x29   :  { %s1248_s29 = scalar_lea.hbm %s1765_s5, 4096 }
  0x2a   :  { %p1249_p2 = scmp.ne.s32.totalorder %s1765_s5, %s1248_s29  ;;  %p1252_p3 = scmp.lt.u32.totalorder %s1248_s29, %s1765_s5 }
  0x2c   :  { %p1254_p4 = pnand %p1252_p3, %p1249_p2 }
  0x2e   :  { %1257 = shalt.err (!%p1254_p4)
}
  0x2f   :  { %s1258_s17 = scalar_lea.vmem %s85_s15, 4096  ;;  %p1263_p6 = scmp.lt.s32.totalorder %s85_s15, %s85_s15 }
  0x30   :  { %p1259_p5 = scmp.ne.s32.totalorder %s85_s15, %s1258_s17  ;;  %p1264_p7 = scmp.lt.s32.totalorder %s1258_s17, %s1258_s17 }
  0x32   :  { %p1265_p8 = por %p1264_p7, %p1263_p6 }
  0x34   :  { %p1266_p9 = pnand %p1265_p8, %p1259_p5 }
  0x36   :  { %1269 = shalt.err (!%p1266_p9)
}
  0x37   :  { %90 = dma.hbm_to_vmem [thread:$0]  %s1765_s5, 4096, %s85_s15, [#allocation12], %s1487_s18, %s1487_s18, %s1488_s24  }
  0x38   :  { %s1489_s19 = smov [#allocation14]   ;;  %s1490_s21 = smov [#allocation17]  }
  0x39   :  { %s106_s20 = sshll.u32 %s1489_s19, 4  ;;  %s128_s22 = sshll.u32 %s1490_s21, 4  ;;  %s107_s20 = int_to_ptr.vmem [resolvable:$true] %s106_s20  ;;  %s129_s22 = int_to_ptr.vmem [resolvable:$true] %s128_s22 }
  0x3a   :  { %s1270_s25 = scalar_lea.hbm %s1767_s7, 4096 }
  0x3b   :  { %p1271_p10 = scmp.ne.s32.totalorder %s1767_s7, %s1270_s25  ;;  %p1274_p11 = scmp.lt.u32.totalorder %s1270_s25, %s1767_s7 }
  0x3d   :  { %p1276_p12 = pnand %p1274_p11, %p1271_p10 }
  0x3f   :  { %1279 = shalt.err (!%p1276_p12)
}
  0x40   :  { %s1280_s5 = scalar_lea.vmem %s107_s20, 4096  ;;  %p1285_p0 = scmp.lt.s32.totalorder %s107_s20, %s107_s20 }
  0x41   :  { %p1281_p13 = scmp.ne.s32.totalorder %s107_s20, %s1280_s5  ;;  %p1286_p1 = scmp.lt.s32.totalorder %s1280_s5, %s1280_s5 }
  0x43   :  { %p1287_p2 = por %p1286_p1, %p1285_p0 }
  0x45   :  { %p1288_p3 = pnand %p1287_p2, %p1281_p13 }
  0x47   :  { %1291 = shalt.err (!%p1288_p3)
}
  0x48   :  { %112 = dma.hbm_to_vmem [thread:$0]  %s1767_s7, 4096, %s107_s20, [#allocation15], %s1487_s18, %s1487_s18, %s1488_s24  }
  0x49   :  { %s1292_s16 = scalar_lea.hbm %s1769_s9, 2048 }
  0x4a   :  { %p1293_p4 = scmp.ne.s32.totalorder %s1769_s9, %s1292_s16  ;;  %p1296_p5 = scmp.lt.u32.totalorder %s1292_s16, %s1769_s9 }
  0x4c   :  { %p1298_p6 = pnand %p1296_p5, %p1293_p4 }
  0x4e   :  { %1301 = shalt.err (!%p1298_p6)
}
  0x4f   :  { %s1302_s21 = scalar_lea.vmem %s129_s22, 2048  ;;  %p1307_p8 = scmp.lt.s32.totalorder %s129_s22, %s129_s22 }
  0x50   :  { %p1303_p7 = scmp.ne.s32.totalorder %s129_s22, %s1302_s21  ;;  %p1308_p9 = scmp.lt.s32.totalorder %s1302_s21, %s1302_s21 }
  0x52   :  { %p1309_p10 = por %p1308_p9, %p1307_p8 }
  0x54   :  { %p1310_p11 = pnand %p1309_p10, %p1303_p7 }
  0x56   :  { %1313 = shalt.err (!%p1310_p11)
}
  0x57   :  { %134 = dma.hbm_to_vmem [thread:$0]  %s1769_s9, 2048, %s129_s22, [#allocation18], %s1487_s18, %s1487_s18, %s1488_s24  }
  0x58   :  { %s1491_s23 = smov [#allocation2]   ;;  %s1492_s25 = smov [#allocation7]  }
  0x59   :  { %s28_s1 = sshll.u32 %s1491_s23, 4  ;;  %s53_s26 = sshll.u32 %s1492_s25, 4  ;;  %s29_s1 = int_to_ptr.vmem [resolvable:$true] %s28_s1  ;;  %s54_s26 = int_to_ptr.vmem [resolvable:$true] %s53_s26 }
  0x5a   :  { %s1314_s29 = scalar_lea.hbm %s1760_s0, 256 }
  0x5b   :  { %p1315_p12 = scmp.ne.s32.totalorder %s1760_s0, %s1314_s29  ;;  %p1318_p13 = scmp.lt.u32.totalorder %s1314_s29, %s1760_s0 }
  0x5d   :  { %p1320_p0 = pnand %p1318_p13, %p1315_p12 }
  0x5f   :  { %1323 = shalt.err (!%p1320_p0)
}
  0x60   :  { %s1324_s9 = scalar_lea.vmem %s29_s1, 256  ;;  %p1329_p2 = scmp.lt.s32.totalorder %s29_s1, %s29_s1 }
  0x61   :  { %p1325_p1 = scmp.ne.s32.totalorder %s29_s1, %s1324_s9  ;;  %p1330_p3 = scmp.lt.s32.totalorder %s1324_s9, %s1324_s9 }
  0x63   :  { %p1331_p4 = por %p1330_p3, %p1329_p2 }
  0x65   :  { %p1332_p5 = pnand %p1331_p4, %p1325_p1 }
  0x67   :  { %1335 = shalt.err (!%p1332_p5)
}
  0x68   :  { %34 = dma.hbm_to_vmem [thread:$0]  %s1760_s0, 256, %s29_s1, [#allocation3], %s1487_s18, %s1487_s18, %s1488_s24  }
  0x69   :  { %s1336_s3 = scalar_lea.hbm %s1762_s2, 128 }
  0x6a   :  { %p1337_p6 = scmp.ne.s32.totalorder %s1762_s2, %s1336_s3  ;;  %p1340_p7 = scmp.lt.u32.totalorder %s1336_s3, %s1762_s2 }
  0x6c   :  { %p1342_p8 = pnand %p1340_p7, %p1337_p6 }
  0x6e   :  { %1345 = shalt.err (!%p1342_p8)
}
  0x6f   :  { %s1346_s20 = scalar_lea.vmem %s54_s26, 128  ;;  %p1351_p10 = scmp.lt.s32.totalorder %s54_s26, %s54_s26 }
  0x70   :  { %p1347_p9 = scmp.ne.s32.totalorder %s54_s26, %s1346_s20  ;;  %p1352_p11 = scmp.lt.s32.totalorder %s1346_s20, %s1346_s20 }
  0x72   :  { %p1353_p12 = por %p1352_p11, %p1351_p10 }
  0x74   :  { %p1354_p13 = pnand %p1353_p12, %p1347_p9 }
  0x76   :  { %1357 = shalt.err (!%p1354_p13)
}
  0x77   :  { %56 = dma.hbm_to_vmem [thread:$0]  %s1762_s2, 128, %s54_s26, [#allocation6]  }
  0x78   :  { %s1493_s24 = smov [#allocation10]   ;;  %s1494_s1 = smov [#allocation13]  }
  0x79   :  { %s75_s23 = sshll.u32 %s1493_s24, 4  ;;  %s97_s25 = sshll.u32 %s1494_s1, 4  ;;  %s76_s23 = int_to_ptr.vmem [resolvable:$true] %s75_s23  ;;  %s98_s25 = int_to_ptr.vmem [resolvable:$true] %s97_s25 }
  0x7a   :  { %s1358_s29 = scalar_lea.hbm %s1764_s4, 16 }
  0x7b   :  { %p1359_p0 = scmp.ne.s32.totalorder %s1764_s4, %s1358_s29  ;;  %p1362_p1 = scmp.lt.u32.totalorder %s1358_s29, %s1764_s4 }
  0x7d   :  { %p1364_p2 = pnand %p1362_p1, %p1359_p0 }
  0x7f   :  { %1367 = shalt.err (!%p1364_p2)
}
  0x80   :  { %s1368_s2 = scalar_lea.vmem %s76_s23, 16  ;;  %s1372_s26 = scalar_lea.vmem %s76_s23, 32 }
  0x81   :  { %p1369_p3 = scmp.ne.s32.totalorder %s76_s23, %s1368_s2  ;;  %p1373_p4 = scmp.lt.s32.totalorder %s76_s23, %s76_s23 }
  0x82   :  { %p1374_p5 = scmp.lt.s32.totalorder %s1372_s26, %s1368_s2 }
  0x84   :  { %p1375_p6 = por %p1374_p5, %p1373_p4 }
  0x86   :  { %p1376_p7 = pnand %p1375_p6, %p1369_p3 }
  0x88   :  { %1379 = shalt.err (!%p1376_p7)
}
  0x89   :  { %78 = dma.hbm_to_vmem [thread:$0]  %s1764_s4, 16, %s76_s23, [#allocation9]  }
  0x8a   :  { %s1380_s17 = scalar_lea.hbm %s1766_s6, 16 }
  0x8b   :  { %p1381_p8 = scmp.ne.s32.totalorder %s1766_s6, %s1380_s17  ;;  %p1384_p9 = scmp.lt.u32.totalorder %s1380_s17, %s1766_s6 }
  0x8d   :  { %p1386_p10 = pnand %p1384_p9, %p1381_p8 }
  0x8f   :  { %1389 = shalt.err (!%p1386_p10)
}
  0x90   :  { %s1390_s7 = scalar_lea.vmem %s98_s25, 16  ;;  %s1394_s20 = scalar_lea.vmem %s98_s25, 32 }
  0x91   :  { %p1391_p11 = scmp.ne.s32.totalorder %s98_s25, %s1390_s7  ;;  %p1395_p12 = scmp.lt.s32.totalorder %s98_s25, %s98_s25 }
  0x92   :  { %p1396_p13 = scmp.lt.s32.totalorder %s1394_s20, %s1390_s7 }
  0x94   :  { %p1397_p0 = por %p1396_p13, %p1395_p12 }
  0x96   :  { %p1398_p1 = pnand %p1397_p0, %p1391_p11 }
  0x98   :  { %1401 = shalt.err (!%p1398_p1)
}
  0x99   :  { %100 = dma.hbm_to_vmem [thread:$0]  %s1766_s6, 16, %s98_s25, [#allocation12]  }
  0x9a   :  { %s1495_s18 = smov [#allocation16]   ;;  %s1496_s23 = smov [#allocation19]  }
  0x9b   :  { %s119_s24 = sshll.u32 %s1495_s18, 4  ;;  %s141_s1 = sshll.u32 %s1496_s23, 4  ;;  %s120_s24 = int_to_ptr.vmem [resolvable:$true] %s119_s24  ;;  %s142_s1 = int_to_ptr.vmem [resolvable:$true] %s141_s1 }
  0x9c   :  { %s1402_s29 = scalar_lea.hbm %s1768_s8, 16 }
  0x9d   :  { %p1403_p2 = scmp.ne.s32.totalorder %s1768_s8, %s1402_s29  ;;  %p1406_p3 = scmp.lt.u32.totalorder %s1402_s29, %s1768_s8 }
  0x9f   :  { %p1408_p4 = pnand %p1406_p3, %p1403_p2 }
  0xa1   :  { %1411 = shalt.err (!%p1408_p4)
}
  0xa2   :  { %s1412_s6 = scalar_lea.vmem %s120_s24, 16  ;;  %s1416_s25 = scalar_lea.vmem %s120_s24, 32 }
  0xa3   :  { %p1413_p5 = scmp.ne.s32.totalorder %s120_s24, %s1412_s6  ;;  %p1417_p6 = scmp.lt.s32.totalorder %s120_s24, %s120_s24 }
  0xa4   :  { %p1418_p7 = scmp.lt.s32.totalorder %s1416_s25, %s1412_s6 }
  0xa6   :  { %p1419_p8 = por %p1418_p7, %p1417_p6 }
  0xa8   :  { %p1420_p9 = pnand %p1419_p8, %p1413_p5 }
  0xaa   :  { %1423 = shalt.err (!%p1420_p9)
}
  0xab   :  { %122 = dma.hbm_to_vmem [thread:$0]  %s1768_s8, 16, %s120_s24, [#allocation15]  }
  0xac   :  { %s1424_s14 = scalar_lea.hbm %s1770_s10, 16 }
  0xad   :  { %p1425_p10 = scmp.ne.s32.totalorder %s1770_s10, %s1424_s14  ;;  %p1428_p11 = scmp.lt.u32.totalorder %s1424_s14, %s1770_s10 }
  0xaf   :  { %p1430_p12 = pnand %p1428_p11, %p1425_p10 }
  0xb1   :  { %1433 = shalt.err (!%p1430_p12)
}
  0xb2   :  { %s1434_s19 = scalar_lea.vmem %s142_s1, 16  ;;  %s1438_s21 = scalar_lea.vmem %s142_s1, 32 }
  0xb3   :  { %p1435_p13 = scmp.ne.s32.totalorder %s142_s1, %s1434_s19  ;;  %p1439_p0 = scmp.lt.s32.totalorder %s142_s1, %s142_s1 }
  0xb4   :  { %p1440_p1 = scmp.lt.s32.totalorder %s1438_s21, %s1434_s19 }
  0xb6   :  { %p1441_p2 = por %p1440_p1, %p1439_p0 }
  0xb8   :  { %p1442_p3 = pnand %p1441_p2, %p1435_p13 }
  0xba   :  { %1445 = shalt.err (!%p1442_p3)
}
  0xbb   :  { %144 = dma.hbm_to_vmem [thread:$0]  %s1770_s10, 16, %s142_s1, [#allocation18]  }
  0xbc   :  { %1468 = dma.done.wait [#allocation3], 256  }
  0xbd   :  { %1469 = vsyncadd [#allocation3], 4294967040 }
  0xbe   :  { %1470 = dma.done.wait [#allocation6], 256  }
  0xbf   :  { %1471 = vsyncadd [#allocation6], 4294967040 }
  0xc0   :  { %1472 = dma.done.wait [#allocation9], 4112  }
  0xc1   :  { %1473 = vsyncadd [#allocation9], 4294963184 }
  0xc2   :  { %1474 = dma.done.wait [#allocation12], 4112  }
  0xc3   :  { %1475 = vsyncadd [#allocation12], 4294963184 }
  0xc4   :  { %1476 = dma.done.wait [#allocation15], 4112  }
  0xc5   :  { %1477 = vsyncadd [#allocation15], 4294963184 }
  0xc6   :  { %1478 = dma.done.wait [#allocation18], 2064  }
  0xc7   :  { %1479 = vsyncadd [#allocation18], 4294965232  ;;  %v1497_v0 = vmov 0.0   ;;  %vm1498_vm0 = vmmov 0   ;;  %v181_v1 = vld [vmem:[#allocation2] sm:$0xff]  ;;  %v1714_v2 = vld [vmem:[#allocation2 + $0x8] sm:$0xff] }
  0xc8   :  { %1001 = vmatprep.subr.bf16.mxu1 %v1497_v0  ;;  %1003 = vmatprep.mubr.msk.bf16.mxu1 %vm1498_vm0, %v1497_v0  ;;  %v216_v3 = vpack.c.bf16 %v1714_v2, %v181_v1  ;;  %v1717_v4 = vld [vmem:[#allocation5] sm:$0xff]   ;;  %v199_v5 = vld [vmem:[#allocation8 + $0x80] sm:$0xff]  ;;  %v200_v6 = vld [vmem:[#allocation8 + $0x88] sm:$0xff]  ;;  %vm222_vm1 = vcmask 130048   ;;  %s1500_s10 = smov [#allocation20]  }
  0xc9   :  { %1007 = vmatprep.subr.bf16.mxu0 %v1497_v0  ;;  %1009 = vmatprep.mubr.msk.bf16.mxu0 %vm1498_vm0, %v1497_v0  ;;  %v183_v7 = vld [vmem:[#allocation8] sm:$0xff]  ;;  %v184_v8 = vld [vmem:[#allocation8 + $0x8] sm:$0xff]  ;;  %v1061_v9 = vpack.c.bf16 %v200_v6, %v199_v5  ;;  %v201_v11 = vld [vmem:[#allocation8 + $0x90] sm:$0xff]  ;;  %s838_s20 = sshll.u32 %s1500_s10, 4  ;;  %s839_s20 = int_to_ptr.vmem [resolvable:$true] %s838_s20 }
  0xca   :  { %1002 = vmatpush3.bf16.msra.mxu1 %v216_v3  ;;  %v1063_v10 = vpack.c.bf16 %v184_v8, %v183_v7  ;;  %v202_v12 = vld [vmem:[#allocation8 + $0x98] sm:$0xff]  ;;  %v185_v14 = vld [vmem:[#allocation8 + $0x10] sm:$0xff]  ;;  %v203_v16 = vld [vmem:[#allocation8 + $0xa0] sm:$0xff]  ;;  %s1446_s4 = scalar_lea.vmem %s839_s20, 128  ;;  %p1451_p5 = scmp.lt.s32.totalorder %s839_s20, %s839_s20 }
  0xcb   :  { %v1065_v13 = vpack.c.bf16 %v202_v12, %v201_v11  ;;  %v186_v15 = vld [vmem:[#allocation8 + $0x18] sm:$0xff]  ;;  %1062 = vmatprep.subr.bf16.mxu1 %v1061_v9  ;;  %v204_v17 = vld [vmem:[#allocation8 + $0xa8] sm:$0xff]  ;;  %v187_v20 = vld [vmem:[#allocation8 + $0x20] sm:$0xff]  ;;  %p1447_p4 = scmp.ne.s32.totalorder %s839_s20, %s1446_s4  ;;  %p1452_p6 = scmp.lt.s32.totalorder %s1446_s4, %s1446_s4 }
  0xcc   :  { %v1067_v18 = vpack.c.bf16 %v186_v15, %v185_v14  ;;  %v1069_v19 = vpack.c.bf16 %v204_v17, %v203_v16  ;;  %v188_v21 = vld [vmem:[#allocation8 + $0x28] sm:$0xff]  ;;  %v205_v22 = vld [vmem:[#allocation8 + $0xb0] sm:$0xff]  ;;  %v206_v23 = vld [vmem:[#allocation8 + $0xb8] sm:$0xff] }
  0xcd   :  { %1004 = vmatmul.mubr.msk.bf16.vlgmr.msra.gmra.mrb[0].mxu1 %vm222_vm1, %v1717_v4  ;;  %v1071_v24 = vpack.c.bf16 %v188_v21, %v187_v20  ;;  %v1073_v25 = vpack.c.bf16 %v206_v23, %v205_v22  ;;  %v189_v26 = vld [vmem:[#allocation8 + $0x30] sm:$0xff]  ;;  %v190_v27 = vld [vmem:[#allocation8 + $0x38] sm:$0xff]  ;;  %v207_v28 = vld [vmem:[#allocation8 + $0xc0] sm:$0xff]  ;;  %p1453_p7 = por %p1452_p6, %p1451_p5 }
  0xce   :  { %1064 = vmatpush3.bf16.msra.mxu1 %v1063_v10  ;;  %337 = vmatprep.mubr.f32.mxu1 %v181_v1  ;;  %v208_v29 = vld [vmem:[#allocation8 + $0xc8] sm:$0xff]  ;;  %v1075_v30 = vpack.c.bf16 %v190_v27, %v189_v26  ;;  %v191_v32 = vld [vmem:[#allocation8 + $0x40] sm:$0xff]  ;;  %v209_v34 = vld [vmem:[#allocation8 + $0xd0] sm:$0xff] }
  0xcf   :  { %1066 = vmatprep.subr.bf16.mxu1 %v1065_v13  ;;  %v1077_v31 = vpack.c.bf16 %v208_v29, %v207_v28  ;;  %v192_v33 = vld [vmem:[#allocation8 + $0x48] sm:$0xff]  ;;  %v210_v35 = vld [vmem:[#allocation8 + $0xd8] sm:$0xff]  ;;  %v193_v38 = vld [vmem:[#allocation8 + $0x50] sm:$0xff]  ;;  %p1454_p8 = pnand %p1453_p7, %p1447_p4 }
  0xd0   :  { %v1079_v36 = vpack.c.bf16 %v192_v33, %v191_v32  ;;  %v1081_v37 = vpack.c.bf16 %v210_v35, %v209_v34  ;;  %v194_v39 = vld [vmem:[#allocation8 + $0x58] sm:$0xff]  ;;  %v211_v40 = vld [vmem:[#allocation8 + $0xe0] sm:$0xff]  ;;  %v212_v41 = vld [vmem:[#allocation8 + $0xe8] sm:$0xff] }
  0xd1   :  { %v1083_v42 = vpack.c.bf16 %v194_v39, %v193_v38  ;;  %v1085_v43 = vpack.c.bf16 %v212_v41, %v211_v40  ;;  %v195_v44 = vld [vmem:[#allocation8 + $0x60] sm:$0xff]  ;;  %v196_v45 = vld [vmem:[#allocation8 + $0x68] sm:$0xff]  ;;  %v213_v46 = vld [vmem:[#allocation8 + $0xf0] sm:$0xff] }
  0xd2   :  { %1068 = vmatpush3.bf16.msra.mxu1 %v1067_v18  ;;  %v214_v47 = vld [vmem:[#allocation8 + $0xf8] sm:$0xff]  ;;  %v1087_v48 = vpack.c.bf16 %v196_v45, %v195_v44  ;;  %v197_v50 = vld [vmem:[#allocation8 + $0x70] sm:$0xff]  ;;  %v854_v60 = vld [vmem:[#allocation10] ss:$0 sm:$0xff] }
  0xd3   :  { %1070 = vmatprep.subr.bf16.mxu1 %v1069_v19  ;;  %v1089_v49 = vpack.c.bf16 %v214_v47, %v213_v46  ;;  %v198_v51 = vld [vmem:[#allocation8 + $0x78] sm:$0xff]  ;;  %v366_v5 = vld [vmem:[#allocation11 + $0x80] sm:$0xff]  ;;  %v367_v6 = vld [vmem:[#allocation11 + $0x88] sm:$0xff] }
  0xd4   :  { %v1091_v52 = vpack.c.bf16 %v198_v51, %v197_v50  ;;  %v1093_v8 = vpack.c.bf16 %v367_v6, %v366_v5  ;;  %v350_v9 = vld [vmem:[#allocation11] sm:$0xff]  ;;  %v351_v10 = vld [vmem:[#allocation11 + $0x8] sm:$0xff]  ;;  %v368_v12 = vld [vmem:[#allocation11 + $0x90] sm:$0xff] }
  0xd5   :  { %v369_v13 = vld [vmem:[#allocation11 + $0x98] sm:$0xff]  ;;  %v1095_v14 = vpack.c.bf16 %v351_v10, %v350_v9  ;;  %v352_v16 = vld [vmem:[#allocation11 + $0x10] sm:$0xff]  ;;  %v370_v18 = vld [vmem:[#allocation11 + $0xa0] sm:$0xff] }
  0xd6   :  { %1072 = vmatpush3.bf16.msra.mxu1 %v1071_v24  ;;  %v1097_v15 = vpack.c.bf16 %v369_v13, %v368_v12  ;;  %v353_v17 = vld [vmem:[#allocation11 + $0x18] sm:$0xff]  ;;  %v371_v19 = vld [vmem:[#allocation11 + $0xa8] sm:$0xff]  ;;  %v354_v22 = vld [vmem:[#allocation11 + $0x20] sm:$0xff] }
  0xd7   :  { %1074 = vmatprep.subr.bf16.mxu1 %v1073_v25  ;;  %v1099_v20 = vpack.c.bf16 %v353_v17, %v352_v16  ;;  %v1101_v21 = vpack.c.bf16 %v371_v19, %v370_v18  ;;  %v355_v23 = vld [vmem:[#allocation11 + $0x28] sm:$0xff]  ;;  %v372_v24 = vld [vmem:[#allocation11 + $0xb0] sm:$0xff]  ;;  %v373_v25 = vld [vmem:[#allocation11 + $0xb8] sm:$0xff] }
  0xd8   :  { %v1103_v26 = vpack.c.bf16 %v355_v23, %v354_v22  ;;  %v1105_v27 = vpack.c.bf16 %v373_v25, %v372_v24  ;;  %v356_v28 = vld [vmem:[#allocation11 + $0x30] sm:$0xff]  ;;  %v357_v29 = vld [vmem:[#allocation11 + $0x38] sm:$0xff]  ;;  %v358_v34 = vld [vmem:[#allocation11 + $0x40] sm:$0xff] }
  0xd9   :  { %v1107_v32 = vpack.c.bf16 %v357_v29, %v356_v28  ;;  %v359_v35 = vld [vmem:[#allocation11 + $0x48] sm:$0xff]  ;;  %v360_v40 = vld [vmem:[#allocation11 + $0x50] sm:$0xff]  ;;  %v361_v41 = vld [vmem:[#allocation11 + $0x58] sm:$0xff] }
  0xda   :  { %1076 = vmatpush3.bf16.msra.mxu1 %v1075_v30  ;;  %v374_v30 = vld [vmem:[#allocation11 + $0xc0] sm:$0xff]  ;;  %v1111_v38 = vpack.c.bf16 %v359_v35, %v358_v34  ;;  %v1115_v44 = vpack.c.bf16 %v361_v41, %v360_v40  ;;  %v363_v47 = vld [vmem:[#allocation11 + $0x68] sm:$0xff]  ;;  %v510_v18 = vld [vmem:[#allocation14 + $0x10] sm:$0xff] }
  0xdb   :  { %1078 = vmatprep.subr.bf16.mxu1 %v1077_v31  ;;  %v375_v31 = vld [vmem:[#allocation11 + $0xc8] sm:$0xff]  ;;  %v362_v46 = vld [vmem:[#allocation11 + $0x60] sm:$0xff]  ;;  %v518_v41 = vld [vmem:[#allocation14 + $0x50] sm:$0xff] }
  0xdc   :  { %v1109_v33 = vpack.c.bf16 %v375_v31, %v374_v30  ;;  %v1119_v50 = vpack.c.bf16 %v363_v47, %v362_v46  ;;  %v525_v9 = vld [vmem:[#allocation14 + $0x88] sm:$0xff]  ;;  %v511_v19 = vld [vmem:[#allocation14 + $0x18] sm:$0xff]  ;;  %v512_v24 = vld [vmem:[#allocation14 + $0x20] sm:$0xff] }
  0xdd   :  { %v509_v12 = vld [vmem:[#allocation14 + $0x8] sm:$0xff]  ;;  %v1131_v22 = vpack.c.bf16 %v511_v19, %v510_v18  ;;  %v514_v30 = vld [vmem:[#allocation14 + $0x30] sm:$0xff]  ;;  %v515_v31 = vld [vmem:[#allocation14 + $0x38] sm:$0xff] }
  0xde   :  { %1080 = vmatpush3.bf16.msra.mxu1 %v1079_v36  ;;  %v376_v36 = vld [vmem:[#allocation11 + $0xd0] sm:$0xff]  ;;  %v1139_v34 = vpack.c.bf16 %v515_v31, %v514_v30  ;;  %v516_v35 = vld [vmem:[#allocation14 + $0x40] sm:$0xff] }
  0xdf   :  { %1082 = vmatprep.subr.bf16.mxu1 %v1081_v37  ;;  %v377_v37 = vld [vmem:[#allocation11 + $0xd8] sm:$0xff]  ;;  %v513_v25 = vld [vmem:[#allocation14 + $0x28] sm:$0xff]  ;;  %v520_v47 = vld [vmem:[#allocation14 + $0x60] sm:$0xff] }
  0xe0   :  { %v1113_v39 = vpack.c.bf16 %v377_v37, %v376_v36  ;;  %v1135_v28 = vpack.c.bf16 %v513_v25, %v512_v24  ;;  %v517_v36 = vld [vmem:[#allocation14 + $0x48] sm:$0xff]  ;;  %v534_v37 = vld [vmem:[#allocation14 + $0xd0] sm:$0xff]  ;;  %v753_v31 = vld [vmem:[#allocation17 + $0x78] sm:$0xff] }
  0xe1   :  { %v744_v19 = vld [vmem:[#allocation17 + $0x30] sm:$0xff] }
  0xe2   :  { %1084 = vmatpush3.bf16.msra.mxu1 %v1083_v42  ;;  %v378_v42 = vld [vmem:[#allocation11 + $0xe0] sm:$0xff]  ;;  %v748_v25 = vld [vmem:[#allocation17 + $0x50] sm:$0xff] }
  0xe3   :  { %1086 = vmatprep.subr.bf16.mxu1 %v1085_v43  ;;  %v379_v43 = vld [vmem:[#allocation11 + $0xe8] sm:$0xff]  ;;  %v752_v30 = vld [vmem:[#allocation17 + $0x70] sm:$0xff] }
  0xe4   :  { %v1117_v45 = vpack.c.bf16 %v379_v43, %v378_v42  ;;  %v519_v42 = vld [vmem:[#allocation14 + $0x58] sm:$0xff]  ;;  %v536_v43 = vld [vmem:[#allocation14 + $0xe0] sm:$0xff] }
  0xe6   :  { %1088 = vmatpush3.bf16.msra.mxu1 %v1087_v48  ;;  %v380_v48 = vld [vmem:[#allocation11 + $0xf0] sm:$0xff] }
  0xe7   :  { %1090 = vmatprep.subr.bf16.mxu1 %v1089_v49  ;;  %v381_v49 = vld [vmem:[#allocation11 + $0xf8] sm:$0xff] }
  0xe8   :  { %v1121_v51 = vpack.c.bf16 %v381_v49, %v380_v48  ;;  %v521_v48 = vld [vmem:[#allocation14 + $0x68] sm:$0xff]  ;;  %v538_v49 = vld [vmem:[#allocation14 + $0xf0] sm:$0xff] }
  0xea   :  { %1092 = vmatpush3.bf16.msra.mxu1 %v1091_v52  ;;  %v364_v52 = vld [vmem:[#allocation11 + $0x70] sm:$0xff] }
  0xeb   :  { %1013 = vmatprep.subr.bf16.mxu1 %v1497_v0 }
 0x1a0   :  { %v260_v53 = vpop.f32.mrb[0].mxu1 }
 0x1a1   :  { %v1005_v54 = vpop.f32.mrb[1].mxu1  ;;  %338 = vmatmul.mubr.f32.vlgmr.msra.gmra.mrb[4].mxu1 %v260_v53  ;;  %v365_v53 = vld [vmem:[#allocation11 + $0x78] sm:$0xff] }
 0x1a2   :  { %v263_v55 = vpop.f32.mrb[2].mxu1  ;;  %342 = vmatprep.mubr.f32.mxu1 %v1714_v2  ;;  %v1123_v54 = vpack.c.bf16 %v365_v53, %v364_v52  ;;  %v522_v53 = vld [vmem:[#allocation14 + $0x70] sm:$0xff] }
 0x1a3   :  { %v1006_v56 = vpop.f32.mrb[3].mxu1 }
 0x1a5   :  { %343 = vmatmul.mubr.f32.gmra.mrb[6].mxu1 %v263_v55 }
 0x1a6   :  { %1015 = vmatprep.mubr.msk.bf16.mxu1 %vm1498_vm0, %v1497_v0 }
 0x274   :  { %v895_v57 = vpop.f32.mrb[4].mxu1 }
 0x275   :  { %v896_v58 = vpop.f32.mrb[5].mxu1 }
 0x276   :  { %v897_v59 = vadd.f32 %v896_v58, %v895_v57 }
 0x278   :  { %v898_v61 = vpop.f32.mrb[6].mxu1  ;;  %v340_v63 = vadd.f32 %v897_v59, %v854_v60 }
 0x279   :  { %v899_v62 = vpop.f32.mrb[7].mxu1 }
 0x27a   :  { %v900_v1 = vadd.f32 %v899_v62, %v898_v61  ;;  %v348_v7 = vmax.f32 %v340_v63, 0.0  ;;  %v856_v62 = vld [vmem:[#allocation13] ss:$0 sm:$0xff] }
 0x27c   :  { %v1725_v3 = vadd.f32 %v900_v1, %v854_v60 }
 0x27e   :  { %v349_v2 = vmax.f32 %v1725_v3, 0.0 }
 0x280   :  { %v383_v11 = vpack.c.bf16 %v349_v2, %v348_v7 }
 0x282   :  { %1008 = vmatpush3.bf16.msra.mxu0 %v383_v11  ;;  %v508_v11 = vld [vmem:[#allocation14] sm:$0xff] }
 0x283   :  { %1094 = vmatprep.subr.bf16.mxu0 %v1093_v8  ;;  %v524_v8 = vld [vmem:[#allocation14 + $0x80] sm:$0xff]  ;;  %v1127_v16 = vpack.c.bf16 %v509_v12, %v508_v11  ;;  %v739_v11 = vld [vmem:[#allocation17 + $0x8] sm:$0xff] }
 0x285   :  { %1010 = vmatmul.mubr.msk.bf16.vlgmr.msra.gmra.mrb[0].mxu0 %vm222_vm1, %v1717_v4 }
 0x286   :  { %495 = vmatprep.mubr.f32.mxu0 %v348_v7  ;;  %1096 = vmatpush3.bf16.msra.mxu0 %v1095_v14  ;;  %v526_v14 = vld [vmem:[#allocation14 + $0x90] sm:$0xff] }
 0x287   :  { %1098 = vmatprep.subr.bf16.mxu0 %v1097_v15  ;;  %v527_v15 = vld [vmem:[#allocation14 + $0x98] sm:$0xff] }
 0x288   :  { %v1129_v17 = vpack.c.bf16 %v527_v15, %v526_v14  ;;  %v741_v14 = vld [vmem:[#allocation17 + $0x18] sm:$0xff] }
 0x28a   :  { %1100 = vmatpush3.bf16.msra.mxu0 %v1099_v20  ;;  %v528_v20 = vld [vmem:[#allocation14 + $0xa0] sm:$0xff] }
 0x28b   :  { %1102 = vmatprep.subr.bf16.mxu0 %v1101_v21  ;;  %v529_v21 = vld [vmem:[#allocation14 + $0xa8] sm:$0xff] }
 0x28c   :  { %v1133_v23 = vpack.c.bf16 %v529_v21, %v528_v20  ;;  %v745_v20 = vld [vmem:[#allocation17 + $0x38] sm:$0xff] }
 0x28d   :  { %v1170_v21 = vpack.c.bf16 %v745_v20, %v744_v19 }
 0x28e   :  { %1104 = vmatpush3.bf16.msra.mxu0 %v1103_v26  ;;  %v530_v26 = vld [vmem:[#allocation14 + $0xb0] sm:$0xff] }
 0x28f   :  { %1106 = vmatprep.subr.bf16.mxu0 %v1105_v27  ;;  %v531_v27 = vld [vmem:[#allocation14 + $0xb8] sm:$0xff] }
 0x290   :  { %v1137_v29 = vpack.c.bf16 %v531_v27, %v530_v26  ;;  %v749_v26 = vld [vmem:[#allocation17 + $0x58] sm:$0xff]  ;;  %v750_v27 = vld [vmem:[#allocation17 + $0x60] sm:$0xff] }
 0x292   :  { %1108 = vmatpush3.bf16.msra.mxu0 %v1107_v32  ;;  %v532_v32 = vld [vmem:[#allocation14 + $0xc0] sm:$0xff] }
 0x293   :  { %1110 = vmatprep.subr.bf16.mxu0 %v1109_v33  ;;  %v533_v33 = vld [vmem:[#allocation14 + $0xc8] sm:$0xff] }
 0x296   :  { %1112 = vmatpush3.bf16.msra.mxu0 %v1111_v38  ;;  %v535_v38 = vld [vmem:[#allocation14 + $0xd8] sm:$0xff] }
 0x297   :  { %1114 = vmatprep.subr.bf16.mxu0 %v1113_v39  ;;  %v1143_v39 = vpack.c.bf16 %v517_v36, %v516_v35  ;;  %v1145_v40 = vpack.c.bf16 %v535_v38, %v534_v37 }
 0x29a   :  { %1116 = vmatpush3.bf16.msra.mxu0 %v1115_v44  ;;  %v537_v44 = vld [vmem:[#allocation14 + $0xe8] sm:$0xff] }
 0x29b   :  { %1118 = vmatprep.subr.bf16.mxu0 %v1117_v45  ;;  %v1147_v45 = vpack.c.bf16 %v519_v42, %v518_v41  ;;  %v1149_v46 = vpack.c.bf16 %v537_v44, %v536_v43 }
 0x29e   :  { %1120 = vmatpush3.bf16.msra.mxu0 %v1119_v50  ;;  %v539_v50 = vld [vmem:[#allocation14 + $0xf8] sm:$0xff] }
 0x29f   :  { %1122 = vmatprep.subr.bf16.mxu0 %v1121_v51  ;;  %v1151_v51 = vpack.c.bf16 %v521_v48, %v520_v47  ;;  %v1153_v52 = vpack.c.bf16 %v539_v50, %v538_v49 }
 0x2a2   :  { %1124 = vmatpush3.bf16.msra.mxu0 %v1123_v54  ;;  %v523_v54 = vld [vmem:[#allocation14 + $0x78] sm:$0xff] }
 0x358   :  { %v418_v55 = vpop.f32.mrb[0].mxu0 }
 0x359   :  { %v1011_v56 = vpop.f32.mrb[1].mxu0  ;;  %496 = vmatmul.mubr.f32.vlgmr.msra.gmra.mrb[4].mxu0 %v418_v55  ;;  %v1155_v55 = vpack.c.bf16 %v523_v54, %v522_v53 }
 0x35a   :  { %v421_v57 = vpop.f32.mrb[2].mxu0  ;;  %500 = vmatprep.mubr.f32.mxu0 %v349_v2  ;;  %v1125_v2 = vpack.c.bf16 %v525_v9, %v524_v8 }
 0x35b   :  { %v1012_v58 = vpop.f32.mrb[3].mxu0 }
 0x35d   :  { %501 = vmatmul.mubr.f32.gmra.mrb[6].mxu0 %v421_v57 }
 0x35e   :  { %1023 = vmatprep.mubr.msk.f32.mxu0 %vm1498_vm0, %v1497_v0 }
 0x42c   :  { %v935_v59 = vpop.f32.mrb[4].mxu0 }
 0x42d   :  { %v936_v60 = vpop.f32.mrb[5].mxu0 }
 0x42e   :  { %v937_v61 = vadd.f32 %v936_v60, %v935_v59  ;;  %v1499_v60 = vmov 0.0|0.0  }
 0x42f   :  { %1157 = vmatprep.subr.bf16.mxu0 %v1499_v60 }
 0x430   :  { %v938_v63 = vpop.f32.mrb[6].mxu0  ;;  %v498_v5 = vadd.f32 %v937_v61, %v856_v62 }
 0x431   :  { %v939_v1 = vpop.f32.mrb[7].mxu0 }
 0x432   :  { %v940_v6 = vadd.f32 %v939_v1, %v938_v63  ;;  %v506_v10 = vmax.f32 %v498_v5, 0.0  ;;  %v858_v5 = vld [vmem:[#allocation16] ss:$0 sm:$0xff] }
 0x434   :  { %v1736_v7 = vadd.f32 %v940_v6, %v856_v62 }
 0x436   :  { %v507_v3 = vmax.f32 %v1736_v7, 0.0 }
 0x438   :  { %v541_v13 = vpack.c.bf16 %v507_v3, %v506_v10 }
 0x43a   :  { %1014 = vmatpush3.bf16.msra.mxu1 %v541_v13  ;;  %v664_v13 = vld [vmem:[#allocation7] sm:$0xff] }
 0x43b   :  { %1126 = vmatprep.subr.bf16.mxu1 %v1125_v2  ;;  %v738_v2 = vld [vmem:[#allocation17] sm:$0xff] }
 0x43c   :  { %v1161_v7 = vpack.c.bf16 %v739_v11, %v738_v2 }
 0x43d   :  { %1016 = vmatmul.mubr.msk.bf16.vlgmr.msra.gmra.mrb[8].mxu1 %vm222_vm1, %v1717_v4  ;;  %v1141_v4 = vpack.c.bf16 %v533_v33, %v532_v32  ;;  %v1182_v32 = vpack.c.bf16 %v753_v31, %v752_v30 }
 0x43e   :  { %653 = vmatprep.mubr.f32.mxu1 %v506_v10  ;;  %1128 = vmatpush3.bf16.msra.mxu1 %v1127_v16  ;;  %v742_v16 = vld [vmem:[#allocation17 + $0x20] sm:$0xff] }
 0x43f   :  { %1130 = vmatprep.subr.bf16.mxu1 %v1129_v17  ;;  %v743_v17 = vld [vmem:[#allocation17 + $0x28] sm:$0xff] }
 0x440   :  { %v1167_v18 = vpack.c.bf16 %v743_v17, %v742_v16 }
 0x442   :  { %1132 = vmatpush3.bf16.msra.mxu1 %v1131_v22  ;;  %v746_v22 = vld [vmem:[#allocation17 + $0x40] sm:$0xff] }
 0x443   :  { %1134 = vmatprep.subr.bf16.mxu1 %v1133_v23  ;;  %v747_v23 = vld [vmem:[#allocation17 + $0x48] sm:$0xff] }
 0x444   :  { %v1173_v24 = vpack.c.bf16 %v747_v23, %v746_v22 }
 0x446   :  { %1136 = vmatpush3.bf16.msra.mxu1 %v1135_v28  ;;  %v751_v28 = vld [vmem:[#allocation17 + $0x68] sm:$0xff] }
 0x447   :  { %1138 = vmatprep.subr.bf16.mxu1 %v1137_v29  ;;  %v1179_v29 = vpack.c.bf16 %v751_v28, %v750_v27 }
 0x44a   :  { %1140 = vmatpush3.bf16.msra.mxu1 %v1139_v34 }
 0x44b   :  { %1142 = vmatprep.subr.bf16.mxu1 %v1141_v4  ;;  %v860_v4 = vld [vmem:[#allocation19] ss:$0 sm:$0xff] }
 0x44e   :  { %1144 = vmatpush3.bf16.msra.mxu1 %v1143_v39 }
 0x44f   :  { %1146 = vmatprep.subr.bf16.mxu1 %v1145_v40 }
 0x452   :  { %1148 = vmatpush3.bf16.msra.mxu1 %v1147_v45 }
 0x453   :  { %1150 = vmatprep.subr.bf16.mxu1 %v1149_v46 }
 0x456   :  { %1152 = vmatpush3.bf16.msra.mxu1 %v1151_v51 }
 0x457   :  { %1154 = vmatprep.subr.bf16.mxu1 %v1153_v52 }
 0x45a   :  { %1156 = vmatpush3.bf16.msra.mxu1 %v1155_v55 }
 0x510   :  { %v576_v56 = vpop.f32.mrb[8].mxu1 }
 0x511   :  { %v1017_v57 = vpop.f32.mrb[9].mxu1  ;;  %654 = vmatmul.mubr.f32.vlgmr.msra.gmra.mrb[12].mxu1 %v576_v56 }
 0x512   :  { %v579_v58 = vpop.f32.mrb[10].mxu1  ;;  %658 = vmatprep.mubr.f32.mxu1 %v507_v3  ;;  %v740_v3 = vld [vmem:[#allocation17 + $0x10] sm:$0xff] }
 0x513   :  { %v1018_v59 = vpop.f32.mrb[11].mxu1  ;;  %v1164_v15 = vpack.c.bf16 %v741_v14, %v740_v3 }
 0x515   :  { %659 = vmatmul.mubr.f32.gmra.mrb[14].mxu1 %v579_v58 }
 0x5e4   :  { %v975_v61 = vpop.f32.mrb[12].mxu1 }
 0x5e5   :  { %v976_v62 = vpop.f32.mrb[13].mxu1 }
 0x5e6   :  { %v977_v63 = vadd.f32 %v976_v62, %v975_v61 }
 0x5e8   :  { %v978_v1 = vpop.f32.mrb[14].mxu1  ;;  %v656_v9 = vadd.f32 %v977_v63, %v858_v5 }
 0x5e9   :  { %v979_v6 = vpop.f32.mrb[15].mxu1 }
 0x5ea   :  { %v980_v8 = vadd.f32 %v979_v6, %v978_v1 }
 0x5ec   :  { %v661_v10 = vadd.f32 %v980_v8, %v858_v5 }
 0x5ee   :  { %v1158_v12 = vpack.c.bf16 %v661_v10, %v656_v9 }
 0x5f0   :  { %1159 = vmatpush3.bf16.msra.mxu0 %v1158_v12 }
 0x5f1   :  { %1160 = vmatprep.subr.bf16.mxu0 %v1499_v60 }
 0x5f3   :  { %1024 = vmatmul.mubr.msk.f32.vlgmr.msra.gmra.mrb[8].mxu0 %vm222_vm1, %v664_v13 }
 0x5f4   :  { %1162 = vmatpush3.bf16.msra.mxu0 %v1161_v7  ;;  %1058 = vmatprep.mubr.msk.f32.mxu0 %vm1498_vm0, %v1497_v0  ;;  %v1176_v0 = vpack.c.bf16 %v749_v26, %v748_v25 }
 0x5f5   :  { %1163 = vmatprep.subr.bf16.mxu0 %v1499_v60 }
 0x5f8   :  { %1165 = vmatpush3.bf16.msra.mxu0 %v1164_v15 }
 0x5f9   :  { %1166 = vmatprep.subr.bf16.mxu0 %v1499_v60 }
 0x5fc   :  { %1168 = vmatpush3.bf16.msra.mxu0 %v1167_v18 }
 0x5fd   :  { %1169 = vmatprep.subr.bf16.mxu0 %v1499_v60 }
 0x600   :  { %1171 = vmatpush3.bf16.msra.mxu0 %v1170_v21 }
 0x601   :  { %1172 = vmatprep.subr.bf16.mxu0 %v1499_v60 }
 0x604   :  { %1174 = vmatpush3.bf16.msra.mxu0 %v1173_v24 }
 0x605   :  { %1175 = vmatprep.subr.bf16.mxu0 %v1499_v60 }
 0x608   :  { %1177 = vmatpush3.bf16.msra.mxu0 %v1176_v0 }
 0x609   :  { %1178 = vmatprep.subr.bf16.mxu0 %v1499_v60 }
 0x60c   :  { %1180 = vmatpush3.bf16.msra.mxu0 %v1179_v29 }
 0x60d   :  { %1181 = vmatprep.subr.bf16.mxu0 %v1499_v60 }
 0x610   :  { %1183 = vmatpush3.bf16.msra.mxu0 %v1182_v32 }
 0x6c6   :  { %v734_v33 = vpop.f32.mrb[8].mxu0 }
 0x6c7   :  { %v1025_v34 = vpop.f32.mrb[9].mxu0  ;;  %1059 = vmatmul.mubr.f32.vlgmr.msra.gmra.mrb[10].mxu0 %v734_v33 }
 0x79a   :  { %v827_v35 = vpop.f32.mrb[10].mxu0 }
 0x79b   :  { %v828_v36 = vadd.f32 %v860_v4, %v827_v35  ;;  %v1060_v37 = vpop.f32.mrb[11].mxu0 }
 0x79d   :  { %831 = vst [vmem:[#allocation20] sm:$0xff] %v828_v36 }
 0x79e   :  { %1457 = shalt.err (!%p1454_p8)
}
 0x79f   :  { %s1458_s24 = scalar_lea.hbm %s1771_s11, 128 }
 0x7a0   :  { %p1459_p9 = scmp.ne.s32.totalorder %s1771_s11, %s1458_s24  ;;  %p1462_p10 = scmp.lt.u32.totalorder %s1458_s24, %s1771_s11 }
 0x7a2   :  { %p1464_p11 = pnand %p1462_p10, %p1459_p9 }
 0x7a4   :  { %1467 = shalt.err (!%p1464_p11)
}
 0x7a5   :  { %841 = dma.vmem_to_hbm [thread:$0]  %s839_s20, 128, %s1771_s11, [#allocation4]  }
 0x7a6   :  { %1480 = dma.done.wait [#allocation4], 128  }
 0x7a7   :  { %1481 = vsyncadd [#allocation4], 4294967168 }
 0x7a8   :  { %845 = vsyncpa [#allocation3], 1 }
 0x7a9   :  { %846 = vsyncpa [#allocation6], 1 }
 0x7aa   :  { %847 = vsyncpa [#allocation9], 1 }
 0x7ab   :  { %848 = vsyncpa [#allocation12], 1 }
 0x7ac   :  { %849 = vsyncpa [#allocation15], 1 }
 0x7ad   :  { %850 = vsyncpa [#allocation18], 1 }
 0x7ae   :  { %851 = vsyncpa [#allocation4], 1 }

</bundles_post_ra>
